<compile_context>
chip_gen: v7x
topology: tpu7x:2x2x1
jax: 0.10.0
libtpu: 0.0.40
codegen_flags: <defaults>
</compile_context>

<pallas_src>
import functools

import jax
import jax.numpy as jnp
from jax.experimental import pallas as pl
from jax.experimental.pallas import tpu as pltpu

_EPS = 1e-5  # PyTorch BatchNorm1d default eps


def _round_up(x, m):
    return (x + m - 1) // m * m


def _residual_block_kernel(x_ref, w1_ref, g1_ref, be1_ref, w2_ref, g2_ref, be2_ref,
                           o_ref, *, has_proj, seq_len, n_rows, cp, mxu_dtype):
    NLp = x_ref.shape[0]
    L = seq_len
    inv_n = 1.0 / n_rows  # divide by the REAL row count (padded rows contribute 0)

    # Sequence-boundary masks, hoisted once as (NLp, 1) column booleans.
    row = jax.lax.broadcasted_iota(jnp.int32, (NLp, 1), 0)
    pos = row % L
    mask_prev = pos == 0                 # l == 0    -> zero the l-1 tap
    mask_next = pos == (L - 1)           # l == L-1  -> zero the l+1 tap
    if NLp != n_rows:
        # roll wraps row 0 into the last padded row's "next" tap; mask that too so
        # conv outputs at padded rows are exactly zero.
        mask_next = mask_next | (row >= n_rows)

    def conv3(v, w_ref):
        """3-tap 'same' conv as 3 accumulated MXU matmuls on roll-shifted operands.

        v: (NLp, C) f32 activations; w_ref: (3, C, Wout) mxu-dtype tap weights.
        Returns (NLp, Wout) f32. The shifts run on the XLU (pltpu.roll), the boundary
        masks are (NLp, 1) broadcasts.
        """
        prev = jnp.where(mask_prev, 0.0, pltpu.roll(v, 1, axis=0))         # v[l-1]
        nxt = jnp.where(mask_next, 0.0, pltpu.roll(v, NLp - 1, axis=0))    # v[l+1]
        acc = jnp.dot(prev.astype(mxu_dtype), w_ref[0],
                      preferred_element_type=jnp.float32)
        acc = acc + jnp.dot(v.astype(mxu_dtype), w_ref[1],
                            preferred_element_type=jnp.float32)
        acc = acc + jnp.dot(nxt.astype(mxu_dtype), w_ref[2],
                            preferred_element_type=jnp.float32)
        return acc

    def bn(h, g_ref, be_ref):
        # Training-mode BatchNorm1d over the n_rows real rows, one-pass stats (sum &
        # sum-of-squares, f32), folded into a per-channel scale/shift.
        s1 = jnp.sum(h, axis=0, keepdims=True)
        s2 = jnp.sum(h * h, axis=0, keepdims=True)
        mu = s1 * inv_n
        var = jnp.maximum(s2 * inv_n - mu * mu, 0.0)
        scale = g_ref[...] * jax.lax.rsqrt(var + _EPS)
        shift = be_ref[...] - mu * scale
        return h * scale + shift

    # NOTE: conv biases are omitted on purpose — a per-channel bias added right before
    # a batch-statistics BatchNorm is cancelled exactly by its mean subtraction.

    x = x_ref[...]                                   # f32
    if has_proj:
        # conv1 + projection conv fused on the lane axis; one conv3, one BN stats sweep.
        hb = bn(conv3(x, w1_ref), g1_ref, be1_ref)   # (NLp, 2*cp)
        h1 = jnp.maximum(hb[:, :cp], 0.0)            # main path (ReLU)
        s = hb[:, cp:]                               # shortcut path (no ReLU)
    else:
        h1 = jnp.maximum(bn(conv3(x, w1_ref), g1_ref, be1_ref), 0.0)
        s = x                                        # identity shortcut, full f32

    if NLp != n_rows:
        # keep padded rows at exactly 0 so they don't bias conv2's batch statistics
        h1 = jnp.where(row >= n_rows, 0.0, h1)

    h2 = bn(conv3(h1, w2_ref), g2_ref, be2_ref)
    o_ref[...] = jnp.maximum(h2 + s, 0.0).astype(o_ref.dtype)


def residual_block(x_ncl, params, stride=1, mxu_dtype=jnp.bfloat16,
                   out_dtype=jnp.float32):
    """x_ncl: (N, Cin, L) float32, PyTorch NCL layout. Returns (N, Cout, L) out_dtype.

    mxu_dtype: dtype of the MXU operands (activations are cast at the matmul only;
    accumulation, BN and the residual add stay float32). bf16 is the default.
    out_dtype: HBM writeback dtype (use bfloat16 in mem-bound production stacks).
    """
    assert stride == 1, "only stride=1 supported"  # TODO(synk): strided conv
    N, Cin, L = x_ncl.shape
    Cout = params['w1'].shape[0]
    has_proj = (stride != 1) or (Cin != Cout)
    NL = N * L

    row_align = 16 if jnp.dtype(mxu_dtype) == jnp.dtype(jnp.bfloat16) else 8
    NLp = _round_up(NL, row_align)       # sublane-aligned matmul M
    Cp = _round_up(Cout, 128)            # lane-dense channels / output

    # NCL -> flattened (N*L, C): channels on lanes, batch*length on sublanes (MXU M).
    x_flat = jnp.transpose(x_ncl, (0, 2, 1)).reshape(NL, Cin).astype(jnp.float32)
    cin_k = Cin if has_proj else Cp      # identity shortcut needs x lane-padded to Cp
    x_flat = jnp.pad(x_flat, ((0, NLp - NL), (0, cin_k - Cin)))

    def taps(w, cin_to, cout_to):        # (Cout, Cin, 3) -> (3, cin_to, cout_to)
        wt = jnp.transpose(w, (2, 1, 0))
        return jnp.pad(wt, ((0, 0), (0, cin_to - wt.shape[1]),
                            (0, cout_to - wt.shape[2]))).astype(mxu_dtype)

    def bn_vec(*vs):                     # lane-pad + concat BN per-channel vectors
        return jnp.concatenate([jnp.pad(v, (0, Cp - Cout)) for v in vs]
                               ).reshape(1, -1).astype(jnp.float32)

    if has_proj:
        # fuse conv1 + projection conv on the output (lane) axis (128-aligned split)
        w1 = jnp.concatenate([taps(params['w1'], Cin, Cp),
                              taps(params['ws'], Cin, Cp)], axis=-1)
        g1 = bn_vec(params['g1'], params['gs'])
        be1 = bn_vec(params['be1'], params['bes'])
    else:
        w1 = taps(params['w1'], Cp, Cp)
        g1, be1 = bn_vec(params['g1']), bn_vec(params['be1'])
    w2 = taps(params['w2'], Cp, Cp)
    g2, be2 = bn_vec(params['g2']), bn_vec(params['be2'])
    args = [x_flat, w1, g1, be1, w2, g2, be2]
    # Conv biases b1/b2/bs are intentionally NOT passed (cancelled by BN, see kernel).

    w1out = w1.shape[-1]
    flops = (2 * NLp * 3 * cin_k * w1out          # conv1 (+ fused projection)
             + 2 * NLp * 3 * Cp * Cp              # conv2
             + 16 * NLp * Cp)                     # BN apply + ReLU + residual (rough)
    bytes_io = int(sum(int(a.size) * a.dtype.itemsize for a in args)
                   + NLp * Cp * jnp.dtype(out_dtype).itemsize)
    inter_bytes = 4 * NLp * (3 * cin_k + 2 * w1out + 3 * Cp)  # rolled taps + temps
    cost = pl.CostEstimate(flops=int(flops), transcendentals=int(w1out + 2 * Cp),
                           bytes_accessed=int(bytes_io + inter_bytes))
    vmem_limit = int(min(64 * 2**20, max(32 * 2**20, 2 * (bytes_io + inter_bytes))))

    out_flat = pl.pallas_call(
        functools.partial(_residual_block_kernel, has_proj=has_proj, seq_len=L,
                          n_rows=NL, cp=Cp, mxu_dtype=mxu_dtype),
        out_shape=jax.ShapeDtypeStruct((NLp, Cp), out_dtype),
        in_specs=[pl.BlockSpec(memory_space=pltpu.MemorySpace.VMEM)] * len(args),
        out_specs=pl.BlockSpec(memory_space=pltpu.MemorySpace.VMEM),
        compiler_params=pltpu.CompilerParams(vmem_limit_bytes=vmem_limit),
        cost_estimate=cost,
    )(*args)

    out = out_flat[:NL, :Cout].reshape(N, L, Cout)
    return jnp.transpose(out, (0, 2, 1))


# ---------------- pure-JAX reference (full PyTorch semantics, NCL, with biases) -------
def _conv1d_ref(x, w, b):
    xp = jnp.pad(x, ((0, 0), (0, 0), (1, 1)))
    L = x.shape[2]
    out = sum(jnp.einsum('oc,ncl->nol', w[:, :, k], xp[:, :, k:k + L]) for k in range(3))
    return out + b[None, :, None]


def _bn_ref(h, g, be):
    mu = h.mean(axis=(0, 2), keepdims=True)
    var = ((h - mu) ** 2).mean(axis=(0, 2), keepdims=True)
    return (h - mu) / jnp.sqrt(var + _EPS) * g[None, :, None] + be[None, :, None]


def _residual_block_ref(x, p, has_proj):
    h = jnp.maximum(_bn_ref(_conv1d_ref(x, p['w1'], p['b1']), p['g1'], p['be1']), 0.0)
    h = _bn_ref(_conv1d_ref(h, p['w2'], p['b2']), p['g2'], p['be2'])
    s = _bn_ref(_conv1d_ref(x, p['ws'], p['bs']), p['gs'], p['bes']) if has_proj else x
    return jnp.maximum(h + s, 0.0)


def _make_params(key, cin, cout):
    ks = jax.random.split(key, 12)
    return {
        'w1': 0.3 * jax.random.normal(ks[0], (cout, cin, 3), jnp.float32),
        'b1': 0.1 * jax.random.normal(ks[1], (cout,), jnp.float32),
        'g1': 1.0 + 0.1 * jax.random.normal(ks[2], (cout,), jnp.float32),
        'be1': 0.1 * jax.random.normal(ks[3], (cout,), jnp.float32),
        'w2': 0.3 * jax.random.normal(ks[4], (cout, cout, 3), jnp.float32),
        'b2': 0.1 * jax.random.normal(ks[5], (cout,), jnp.float32),
        'g2': 1.0 + 0.1 * jax.random.normal(ks[6], (cout,), jnp.float32),
        'be2': 0.1 * jax.random.normal(ks[7], (cout,), jnp.float32),
        'ws': 0.3 * jax.random.normal(ks[8], (cout, cin, 3), jnp.float32),
        'bs': 0.1 * jax.random.normal(ks[9], (cout,), jnp.float32),
        'gs': 1.0 + 0.1 * jax.random.normal(ks[10], (cout,), jnp.float32),
        'bes': 0.1 * jax.random.normal(ks[11], (cout,), jnp.float32),
    }


if __name__ == "__main__":
    key = jax.random.PRNGKey(0)
    kp1, kp2, kx1, kx2 = jax.random.split(key, 4)

    # Test 1: inchannal=4, outchannal=8 -> projection shortcut. N=2, L=16.
    N, Cin, Cout, L = 2, 4, 8, 16
    p1 = _make_params(kp1, Cin, Cout)
    x1 = jax.random.normal(kx1, (N, Cin, L), jnp.float32)
    ref1 = _residual_block_ref(x1, p1, has_proj=True)

    # f32 MXU operands: tight check of the kernel math (roll taps, fused BN, padding).
    out1 = jax.block_until_ready(residual_block(x1, p1, mxu_dtype=jnp.float32))
    assert out1.shape == (N, Cout, L), out1.shape
    err1 = float(jnp.max(jnp.abs(out1 - ref1)))
    assert jnp.allclose(out1, ref1, atol=1e-3, rtol=1e-3), f"proj f32 err {err1}"

    # default bf16 MXU operands (f32 accumulation / BN): production path.
    out1b = jax.block_until_ready(residual_block(x1, p1))
    err1b = float(jnp.max(jnp.abs(out1b - ref1)))
    assert jnp.allclose(out1b, ref1, atol=1e-1, rtol=1e-1), f"proj bf16 err {err1b}"

    # Test 2: inchannal == outchannal -> identity shortcut path.
    p2 = _make_params(kp2, Cout, Cout)
    x2 = jax.random.normal(kx2, (N, Cout, L), jnp.float32)
    ref2 = _residual_block_ref(x2, p2, has_proj=False)

    out2 = jax.block_until_ready(residual_block(x2, p2, mxu_dtype=jnp.float32))
    err2 = float(jnp.max(jnp.abs(out2 - ref2)))
    assert jnp.allclose(out2, ref2, atol=1e-3, rtol=1e-3), f"identity f32 err {err2}"

    out2b = jax.block_until_ready(residual_block(x2, p2))
    err2b = float(jnp.max(jnp.abs(out2b - ref2)))
    assert jnp.allclose(out2b, ref2, atol=1e-1, rtol=1e-1), f"identity bf16 err {err2b}"

    # bf16 output writeback path (mem-bound production option) — smoke test.
    out1c = jax.block_until_ready(
        residual_block(x1, p1, out_dtype=jnp.bfloat16)).astype(jnp.float32)
    err1c = float(jnp.max(jnp.abs(out1c - ref1)))
    assert jnp.allclose(out1c, ref1, atol=1.5e-1, rtol=1.5e-1), f"bf16-out err {err1c}"

    print("KERNEL_OK")
</pallas_src>

<mosaic_0001>
module attributes {stable_mosaic.version = 11 : i64} {
  func.func @_residual_block_kernel(%arg0: memref<32x4xf32, #tpu.memory_space<vmem>>, %arg1: memref<3x4x256xf32, #tpu.memory_space<vmem>>, %arg2: memref<1x256xf32, #tpu.memory_space<vmem>>, %arg3: memref<1x256xf32, #tpu.memory_space<vmem>>, %arg4: memref<3x128x128xf32, #tpu.memory_space<vmem>>, %arg5: memref<1x128xf32, #tpu.memory_space<vmem>>, %arg6: memref<1x128xf32, #tpu.memory_space<vmem>>, %arg7: memref<32x128xf32, #tpu.memory_space<vmem>>) attributes {dimension_semantics = [], scalar_prefetch = 0 : i64, scratch_operands = 0 : i64, tpu.core_type = #tpu.core_type<tc>} {
    %0 = tpu.iota {dimensions = array<i32: 0>} : vector<32x1xi32>
    %c16_i32 = arith.constant 16 : i32
    %c0_i32 = arith.constant 0 : i32
    %1 = arith.cmpi eq, %c16_i32, %c0_i32 : i32
    %c1_i32 = arith.constant 1 : i32
    %2 = arith.select %1, %c1_i32, %c16_i32 : i32
    %3 = vector.broadcast %2 : i32 to vector<32x1xi32>
    %4 = arith.remsi %0, %3 : vector<32x1xi32>
    %c0_i32_0 = arith.constant 0 : i32
    %5 = vector.broadcast %c0_i32_0 : i32 to vector<32x1xi32>
    %6 = arith.cmpi ne, %4, %5 : vector<32x1xi32>
    %c0_i32_1 = arith.constant 0 : i32
    %7 = vector.broadcast %c0_i32_1 : i32 to vector<32x1xi32>
    %8 = arith.cmpi slt, %4, %7 : vector<32x1xi32>
    %c0_i32_2 = arith.constant 0 : i32
    %9 = arith.cmpi slt, %2, %c0_i32_2 : i32
    %10 = vector.broadcast %9 : i1 to vector<32x1xi1>
    %11 = vector.broadcast %10 : vector<32x1xi1> to vector<32x1xi1>
    %12 = arith.xori %8, %11 : vector<32x1xi1>
    %13 = arith.andi %12, %6 : vector<32x1xi1>
    %14 = vector.broadcast %2 : i32 to vector<32x1xi32>
    %15 = arith.addi %4, %14 : vector<32x1xi32>
    %16 = arith.select %13, %15, %4 : vector<32x1xi1>, vector<32x1xi32>
    %c0_i32_3 = arith.constant 0 : i32
    %17 = vector.broadcast %c0_i32_3 : i32 to vector<32x1xi32>
    %18 = arith.cmpi eq, %16, %17 : vector<32x1xi32>
    %c15_i32 = arith.constant 15 : i32
    %19 = vector.broadcast %c15_i32 : i32 to vector<32x1xi32>
    %20 = arith.cmpi eq, %16, %19 : vector<32x1xi32>
    %c0 = arith.constant 0 : index
    %c0_4 = arith.constant 0 : index
    %21 = vector.load %arg0[%c0, %c0_4] : memref<32x4xf32, #tpu.memory_space<vmem>>, vector<32x4xf32>
    %c1_i32_5 = arith.constant 1 : i32
    %22 = tpu.dynamic_rotate %21 by %c1_i32_5 dim 0 : vector<32x4xf32>, i32 -> vector<32x4xf32>
    %cst = arith.constant 0.000000e+00 : f32
    %23 = vector.shape_cast %18 : vector<32x1xi1> to vector<32x1xi1>
    %24 = vector.broadcast %23 : vector<32x1xi1> to vector<32x4xi1>
    %25 = vector.broadcast %cst : f32 to vector<32x4xf32>
    %26 = arith.select %24, %25, %22 : vector<32x4xi1>, vector<32x4xf32>
    %c31_i32 = arith.constant 31 : i32
    %27 = tpu.dynamic_rotate %21 by %c31_i32 dim 0 : vector<32x4xf32>, i32 -> vector<32x4xf32>
    %cst_6 = arith.constant 0.000000e+00 : f32
    %28 = vector.shape_cast %20 : vector<32x1xi1> to vector<32x1xi1>
    %29 = vector.broadcast %28 : vector<32x1xi1> to vector<32x4xi1>
    %30 = vector.broadcast %cst_6 : f32 to vector<32x4xf32>
    %31 = arith.select %29, %30, %27 : vector<32x4xi1>, vector<32x4xf32>
    %c0_7 = arith.constant 0 : index
    %c0_8 = arith.constant 0 : index
    %c0_9 = arith.constant 0 : index
    %32 = vector.load %arg1[%c0_7, %c0_8, %c0_9] : memref<3x4x256xf32, #tpu.memory_space<vmem>>, vector<1x4x256xf32>
    %33 = vector.shape_cast %32 : vector<1x4x256xf32> to vector<4x256xf32>
    %cst_10 = arith.constant dense<0.000000e+00> : vector<32x256xf32>
    %34 = tpu.matmul %26, %33, %cst_10 {dimension_numbers = #tpu.dot_dimension_numbers<[1], [0], [0], [1], [0, 0, 1, 1], [], []>} : vector<32x4xf32>, vector<4x256xf32>, vector<32x256xf32> -> vector<32x256xf32>
    %c1 = arith.constant 1 : index
    %c0_11 = arith.constant 0 : index
    %c0_12 = arith.constant 0 : index
    %35 = vector.load %arg1[%c1, %c0_11, %c0_12] : memref<3x4x256xf32, #tpu.memory_space<vmem>>, vector<1x4x256xf32>
    %36 = vector.shape_cast %35 : vector<1x4x256xf32> to vector<4x256xf32>
    %cst_13 = arith.constant dense<0.000000e+00> : vector<32x256xf32>
    %37 = tpu.matmul %21, %36, %cst_13 {dimension_numbers = #tpu.dot_dimension_numbers<[1], [0], [0], [1], [0, 0, 1, 1], [], []>} : vector<32x4xf32>, vector<4x256xf32>, vector<32x256xf32> -> vector<32x256xf32>
    %38 = arith.addf %34, %37 : vector<32x256xf32>
    %c2 = arith.constant 2 : index
    %c0_14 = arith.constant 0 : index
    %c0_15 = arith.constant 0 : index
    %39 = vector.load %arg1[%c2, %c0_14, %c0_15] : memref<3x4x256xf32, #tpu.memory_space<vmem>>, vector<1x4x256xf32>
    %40 = vector.shape_cast %39 : vector<1x4x256xf32> to vector<4x256xf32>
    %cst_16 = arith.constant dense<0.000000e+00> : vector<32x256xf32>
    %41 = tpu.matmul %31, %40, %cst_16 {dimension_numbers = #tpu.dot_dimension_numbers<[1], [0], [0], [1], [0, 0, 1, 1], [], []>} : vector<32x4xf32>, vector<4x256xf32>, vector<32x256xf32> -> vector<32x256xf32>
    %42 = arith.addf %38, %41 : vector<32x256xf32>
    %cst_17 = arith.constant dense<0.000000e+00> : vector<256xf32>
    %43 = vector.multi_reduction <add>, %42, %cst_17 [0] : vector<32x256xf32> to vector<256xf32>
    %44 = vector.shape_cast %43 : vector<256xf32> to vector<1x256xf32>
    %45 = arith.mulf %42, %42 : vector<32x256xf32>
    %cst_18 = arith.constant dense<0.000000e+00> : vector<256xf32>
    %46 = vector.multi_reduction <add>, %45, %cst_18 [0] : vector<32x256xf32> to vector<256xf32>
    %47 = vector.shape_cast %46 : vector<256xf32> to vector<1x256xf32>
    %cst_19 = arith.constant 3.125000e-02 : f32
    %48 = vector.broadcast %cst_19 : f32 to vector<1x256xf32>
    %49 = arith.mulf %44, %48 : vector<1x256xf32>
    %cst_20 = arith.constant 3.125000e-02 : f32
    %50 = vector.broadcast %cst_20 : f32 to vector<1x256xf32>
    %51 = arith.mulf %47, %50 : vector<1x256xf32>
    %52 = arith.mulf %49, %49 : vector<1x256xf32>
    %53 = arith.subf %51, %52 : vector<1x256xf32>
    %cst_21 = arith.constant 0.000000e+00 : f32
    %54 = vector.broadcast %cst_21 : f32 to vector<1x256xf32>
    %55 = arith.maximumf %53, %54 : vector<1x256xf32>
    %c0_22 = arith.constant 0 : index
    %c0_23 = arith.constant 0 : index
    %56 = vector.load %arg2[%c0_22, %c0_23] : memref<1x256xf32, #tpu.memory_space<vmem>>, vector<1x256xf32>
    %cst_24 = arith.constant 9.99999974E-6 : f32
    %57 = vector.broadcast %cst_24 : f32 to vector<1x256xf32>
    %58 = arith.addf %55, %57 : vector<1x256xf32>
    %59 = math.rsqrt %58 : vector<1x256xf32>
    %60 = arith.mulf %56, %59 : vector<1x256xf32>
    %c0_25 = arith.constant 0 : index
    %c0_26 = arith.constant 0 : index
    %61 = vector.load %arg3[%c0_25, %c0_26] : memref<1x256xf32, #tpu.memory_space<vmem>>, vector<1x256xf32>
    %62 = arith.mulf %49, %60 : vector<1x256xf32>
    %63 = arith.subf %61, %62 : vector<1x256xf32>
    %64 = vector.broadcast %60 : vector<1x256xf32> to vector<32x256xf32>
    %65 = arith.mulf %42, %64 : vector<32x256xf32>
    %66 = vector.broadcast %63 : vector<1x256xf32> to vector<32x256xf32>
    %67 = arith.addf %65, %66 : vector<32x256xf32>
    %68 = vector.extract_strided_slice %67 {offsets = [0, 0], sizes = [32, 128], strides = [1, 1]} : vector<32x256xf32> to vector<32x128xf32>
    %cst_27 = arith.constant 0.000000e+00 : f32
    %69 = vector.broadcast %cst_27 : f32 to vector<32x128xf32>
    %70 = arith.maximumf %68, %69 : vector<32x128xf32>
    %71 = vector.extract_strided_slice %67 {offsets = [0, 128], sizes = [32, 128], strides = [1, 1]} : vector<32x256xf32> to vector<32x128xf32>
    %c1_i32_28 = arith.constant 1 : i32
    %72 = tpu.dynamic_rotate %70 by %c1_i32_28 dim 0 : vector<32x128xf32>, i32 -> vector<32x128xf32>
    %cst_29 = arith.constant 0.000000e+00 : f32
    %73 = vector.shape_cast %18 : vector<32x1xi1> to vector<32x1xi1>
    %74 = vector.broadcast %73 : vector<32x1xi1> to vector<32x128xi1>
    %75 = vector.broadcast %cst_29 : f32 to vector<32x128xf32>
    %76 = arith.select %74, %75, %72 : vector<32x128xi1>, vector<32x128xf32>
    %c31_i32_30 = arith.constant 31 : i32
    %77 = tpu.dynamic_rotate %70 by %c31_i32_30 dim 0 : vector<32x128xf32>, i32 -> vector<32x128xf32>
    %cst_31 = arith.constant 0.000000e+00 : f32
    %78 = vector.shape_cast %20 : vector<32x1xi1> to vector<32x1xi1>
    %79 = vector.broadcast %78 : vector<32x1xi1> to vector<32x128xi1>
    %80 = vector.broadcast %cst_31 : f32 to vector<32x128xf32>
    %81 = arith.select %79, %80, %77 : vector<32x128xi1>, vector<32x128xf32>
    %c0_32 = arith.constant 0 : index
    %c0_33 = arith.constant 0 : index
    %c0_34 = arith.constant 0 : index
    %82 = vector.load %arg4[%c0_32, %c0_33, %c0_34] : memref<3x128x128xf32, #tpu.memory_space<vmem>>, vector<1x128x128xf32>
    %83 = vector.shape_cast %82 : vector<1x128x128xf32> to vector<128x128xf32>
    %cst_35 = arith.constant dense<0.000000e+00> : vector<32x128xf32>
    %84 = tpu.matmul %76, %83, %cst_35 {dimension_numbers = #tpu.dot_dimension_numbers<[1], [0], [0], [1], [0, 0, 1, 1], [], []>} : vector<32x128xf32>, vector<128x128xf32>, vector<32x128xf32> -> vector<32x128xf32>
    %c1_36 = arith.constant 1 : index
    %c0_37 = arith.constant 0 : index
    %c0_38 = arith.constant 0 : index
    %85 = vector.load %arg4[%c1_36, %c0_37, %c0_38] : memref<3x128x128xf32, #tpu.memory_space<vmem>>, vector<1x128x128xf32>
    %86 = vector.shape_cast %85 : vector<1x128x128xf32> to vector<128x128xf32>
    %cst_39 = arith.constant dense<0.000000e+00> : vector<32x128xf32>
    %87 = tpu.matmul %70, %86, %cst_39 {dimension_numbers = #tpu.dot_dimension_numbers<[1], [0], [0], [1], [0, 0, 1, 1], [], []>} : vector<32x128xf32>, vector<128x128xf32>, vector<32x128xf32> -> vector<32x128xf32>
    %88 = arith.addf %84, %87 : vector<32x128xf32>
    %c2_40 = arith.constant 2 : index
    %c0_41 = arith.constant 0 : index
    %c0_42 = arith.constant 0 : index
    %89 = vector.load %arg4[%c2_40, %c0_41, %c0_42] : memref<3x128x128xf32, #tpu.memory_space<vmem>>, vector<1x128x128xf32>
    %90 = vector.shape_cast %89 : vector<1x128x128xf32> to vector<128x128xf32>
    %cst_43 = arith.constant dense<0.000000e+00> : vector<32x128xf32>
    %91 = tpu.matmul %81, %90, %cst_43 {dimension_numbers = #tpu.dot_dimension_numbers<[1], [0], [0], [1], [0, 0, 1, 1], [], []>} : vector<32x128xf32>, vector<128x128xf32>, vector<32x128xf32> -> vector<32x128xf32>
    %92 = arith.addf %88, %91 : vector<32x128xf32>
    %cst_44 = arith.constant dense<0.000000e+00> : vector<128xf32>
    %93 = vector.multi_reduction <add>, %92, %cst_44 [0] : vector<32x128xf32> to vector<128xf32>
    %94 = vector.shape_cast %93 : vector<128xf32> to vector<1x128xf32>
    %95 = arith.mulf %92, %92 : vector<32x128xf32>
    %cst_45 = arith.constant dense<0.000000e+00> : vector<128xf32>
    %96 = vector.multi_reduction <add>, %95, %cst_45 [0] : vector<32x128xf32> to vector<128xf32>
    %97 = vector.shape_cast %96 : vector<128xf32> to vector<1x128xf32>
    %cst_46 = arith.constant 3.125000e-02 : f32
    %98 = vector.broadcast %cst_46 : f32 to vector<1x128xf32>
    %99 = arith.mulf %94, %98 : vector<1x128xf32>
    %cst_47 = arith.constant 3.125000e-02 : f32
    %100 = vector.broadcast %cst_47 : f32 to vector<1x128xf32>
    %101 = arith.mulf %97, %100 : vector<1x128xf32>
    %102 = arith.mulf %99, %99 : vector<1x128xf32>
    %103 = arith.subf %101, %102 : vector<1x128xf32>
    %cst_48 = arith.constant 0.000000e+00 : f32
    %104 = vector.broadcast %cst_48 : f32 to vector<1x128xf32>
    %105 = arith.maximumf %103, %104 : vector<1x128xf32>
    %c0_49 = arith.constant 0 : index
    %c0_50 = arith.constant 0 : index
    %106 = vector.load %arg5[%c0_49, %c0_50] : memref<1x128xf32, #tpu.memory_space<vmem>>, vector<1x128xf32>
    %cst_51 = arith.constant 9.99999974E-6 : f32
    %107 = vector.broadcast %cst_51 : f32 to vector<1x128xf32>
    %108 = arith.addf %105, %107 : vector<1x128xf32>
    %109 = math.rsqrt %108 : vector<1x128xf32>
    %110 = arith.mulf %106, %109 : vector<1x128xf32>
    %c0_52 = arith.constant 0 : index
    %c0_53 = arith.constant 0 : index
    %111 = vector.load %arg6[%c0_52, %c0_53] : memref<1x128xf32, #tpu.memory_space<vmem>>, vector<1x128xf32>
    %112 = arith.mulf %99, %110 : vector<1x128xf32>
    %113 = arith.subf %111, %112 : vector<1x128xf32>
    %114 = vector.broadcast %110 : vector<1x128xf32> to vector<32x128xf32>
    %115 = arith.mulf %92, %114 : vector<32x128xf32>
    %116 = vector.broadcast %113 : vector<1x128xf32> to vector<32x128xf32>
    %117 = arith.addf %115, %116 : vector<32x128xf32>
    %118 = arith.addf %117, %71 : vector<32x128xf32>
    %cst_54 = arith.constant 0.000000e+00 : f32
    %119 = vector.broadcast %cst_54 : f32 to vector<32x128xf32>
    %120 = arith.maximumf %118, %119 : vector<32x128xf32>
    %c0_55 = arith.constant 0 : index
    %c0_56 = arith.constant 0 : index
    %121 = vector.load %arg7[%c0_55, %c0_56] : memref<32x128xf32, #tpu.memory_space<vmem>>, vector<32x128xf32>
    tpu.vector_store %arg7[%c0_55, %c0_56], %120 {strides = array<i32>} : memref<32x128xf32, #tpu.memory_space<vmem>>, vector<32x128xf32>,
    return
  }
}

</mosaic_0001>

<bundles_post_ra>
// kernel: tpu_custom_call.1
= control target key start
LH: loop header
LB: loop body
LE: loop exit
PB: predicated region body
PF: predicated region fallthrough
CT: control target
= control target key end

     0   :  { %12 = vsyncpa [#allocation3], 0  ;;  %s1710_s0 = inlined_call_operand.vmem [shape: f32[32,4], index: 0, kind: input, shape index: {}]   ;;  %s1711_s1 = inlined_call_operand.vmem [shape: f32[3,4,256], index: 1, kind: input, shape index: {}]   ;;  %s1712_s2 = inlined_call_operand.vmem [shape: f32[1,256], index: 2, kind: input, shape index: {}]   ;;  %s1713_s3 = inlined_call_operand.vmem [shape: f32[1,256], index: 3, kind: input, shape index: {}]   ;;  %s1714_s4 = inlined_call_operand.hbm [shape: f32[3,128,128], index: 4, kind: input, shape index: {}]   ;;  %s1715_s5 = inlined_call_operand.vmem [shape: f32[1,128], index: 5, kind: input, shape index: {}]   ;;  %s1716_s6 = inlined_call_operand.vmem [shape: f32[1,128], index: 6, kind: input, shape index: {}]   ;;  %s1717_s7 = inlined_call_operand.hbm [shape: f32[32,128], index: 7, kind: output, shape index: {}]  }
   0x1   :  { %13 = vsyncpa [#allocation4], 0  ;;  %s1427_s24 = smov [#allocation2]   ;;  %s1379_s28 = scalar_lea.hbm %s1714_s4, 6144 }
   0x2   :  { %s27_s25 = sshll.u32 %s1427_s24, 4  ;;  %p1380_p0 = scmp.ne.s32.totalorder %s1714_s4, %s1379_s28  ;;  %s28_s25 = int_to_ptr.vmem [resolvable:$true] %s27_s25 }
   0x3   :  { %p1383_p1 = scmp.lt.u32.totalorder %s1379_s28, %s1714_s4 }
   0x5   :  { %p1385_p2 = pnand %p1383_p1, %p1380_p0 }
   0x7   :  { %1388 = shalt.err (!%p1385_p2)
}
   0x8   :  { %s1389_s10 = scalar_lea.vmem %s28_s25, 6144  ;;  %p1394_p4 = scmp.lt.s32.totalorder %s28_s25, %s28_s25 }
   0x9   :  { %p1390_p3 = scmp.ne.s32.totalorder %s28_s25, %s1389_s10  ;;  %p1395_p5 = scmp.lt.s32.totalorder %s1389_s10, %s1389_s10 }
   0xb   :  { %p1396_p6 = por %p1395_p5, %p1394_p4 }
   0xd   :  { %p1397_p7 = pnand %p1396_p6, %p1390_p3 }
   0xf   :  { %1400 = shalt.err (!%p1397_p7)
}
  0x10   :  { %s1428_s11 = smov 128   ;;  %s1429_s12 = smov 8  }
  0x11   :  { %33 = dma.hbm_to_vmem [thread:$0]  %s1714_s4, 6144, %s28_s25, [#allocation3], %s1428_s11, %s1428_s11, %s1429_s12  }
  0x12   :  { %1423 = dma.done.wait [#allocation3], 6144  }
  0x13   :  { %1424 = vsyncadd [#allocation3], 4294961152  ;;  %v1430_v0 = vmov 0.0   ;;  %v1042_v1 = vld [vmem:[%s1711_s1 + $0x8] sm:$0xff]  ;;  %vm166_vm0 = vcmask 1043456   ;;  %v148_v2 = vld [vmem:[%s1711_s1] sm:$0xff]  ;;  %v41_v7 = vlaneseq }
  0x14   :  { %235 = vmatprep.mubr.f32.mxu0 %v1430_v0  ;;  %v152_v3 = vcombine.high %v1042_v1, %v1042_v1  ;;  %v261_v4 = vcombine.high %v148_v2, %v148_v2  ;;  %v1498_v5 = vld [vmem:[%s1710_s0] sm:$0xff]  ;;  %vm153_vm1 = vcmask 31744   ;;  %v1055_v6 = vld [vmem:[%s1711_s1 + $0x10] sm:$0xff]  ;;  %v103_v9 = vld [vmem:[%s1710_s0 + $0x8] sm:$0xff] }
  0x15   :  { %v370_v8 = vcombine.high %v1055_v6, %v1055_v6  ;;  %v1513_v10 = vshrl.u32 %v41_v7, 7  ;;  %v105_v11 = vld [vmem:[%s1710_s0 + $0x18] sm:$0xff]  ;;  %v104_v12 = vld [vmem:[%s1710_s0 + $0x10] sm:$0xff]  ;;  %v106_v13 = vrot.slane %v1498_v5, 7  ;;  %v107_v19 = vrot.slane %v103_v9, 7  ;;  %v668_v45 = vld [vmem:[#allocation2 + $0x88] sm:$0xff] }
  0x16   :  { %1043 = vmatprep.subr.msk.mxu0 %vm166_vm0, %v152_v3  ;;  %v109_v14 = vrot.slane %v105_v11, 7  ;;  %v108_v21 = vrot.slane %v104_v12, 7  ;;  %v127_v28 = vrot.slane %v1498_v5, 1  ;;  %v128_v29 = vrot.slane %v103_v9, 1  ;;  %v667_v44 = vld [vmem:[#allocation2 + $0x80] sm:$0xff]  ;;  %v651_v48 = vld [vmem:[#allocation2 + $0x8] sm:$0xff] }
  0x17   :  { %1044 = vmatpush1.msk.msra.mxu0 %vm166_vm0, %v1042_v1  ;;  %v50_v15 = vand.u32 15, %v1513_v10  ;;  %vm110_vm2 = vcmp.lt.s32.totalorder %v1513_v10, 1  ;;  %v44_v18 = vadd.s32 16, %v1513_v10  ;;  %v43_v27 = vadd.s32 8, %v1513_v10  ;;  %v650_v47 = vld [vmem:[#allocation2] sm:$0xff]  ;;  %v669_v50 = vld [vmem:[#allocation2 + $0x90] sm:$0xff] }
  0x18   :  { %1045 = vmatmul.mubr.msk.f32.vlgmr.msra.gmra.mrb[0].mxu0 %vm153_vm1, %v1498_v5  ;;  %1049 = vmatprep.subr.msk.mxu0 %vm166_vm0, %v261_v4  ;;  %v114_v17 = vsel %vm110_vm2, %v109_v14, %v106_v13  ;;  %v113_v23 = vsel %vm110_vm2, %v106_v13, %v107_v19  ;;  %v112_v25 = vsel %vm110_vm2, %v107_v19, %v108_v21  ;;  %v129_v31 = vrot.slane %v104_v12, 1  ;;  %v670_v51 = vld [vmem:[#allocation2 + $0x98] sm:$0xff]  ;;  %v652_v53 = vld [vmem:[#allocation2 + $0x10] sm:$0xff]  ;;  %v671_v56 = vld [vmem:[#allocation2 + $0xa0] sm:$0xff] }
  0x19   :  { %1050 = vmatpush1.msk.msra.mxu0 %vm166_vm0, %v148_v2  ;;  %241 = vmatprep.mubr.f32.mxu0 %v1430_v0  ;;  %vm1529_vm3 = vcmp.eq.s32.totalorder %v50_v15, 0  ;;  %v64_v22 = vand.u32 15, %v44_v18  ;;  %v111_v30 = vsel %vm110_vm2, %v108_v21, %v109_v14  ;;  %vm131_vm5 = vcmp.lt.s32.totalorder %v1513_v10, 7  ;;  %v653_v54 = vld [vmem:[#allocation2 + $0x18] sm:$0xff]  ;;  %v672_v57 = vld [vmem:[#allocation2 + $0xa8] sm:$0xff]  ;;  %v654_v59 = vld [vmem:[#allocation2 + $0x20] sm:$0xff] }
  0x1a   :  { %1056 = vmatprep.subr.msk.mxu0 %vm166_vm0, %v370_v8  ;;  %v123_v20 = vsel %vm1529_vm3, 0.0, %v114_v17  ;;  %v57_v32 = vand.u32 15, %v43_v27  ;;  %v134_v33 = vsel %vm131_vm5, %v127_v28, %v128_v29  ;;  %v133_v35 = vsel %vm131_vm5, %v128_v29, %v129_v31  ;;  %v655_v60 = vld [vmem:[#allocation2 + $0x28] sm:$0xff]  ;;  %v673_v62 = vld [vmem:[#allocation2 + $0xb0] sm:$0xff]  ;;  %v674_v63 = vld [vmem:[#allocation2 + $0xb8] sm:$0xff] }
  0x1b   :  { %vm1545_vm4 = vcmp.eq.s32.totalorder %v64_v22, 0  ;;  %v45_v36 = vadd.s32 24, %v1513_v10  ;;  %v130_v37 = vrot.slane %v105_v11, 1  ;;  %v1244_v46 = vpack.c.bf16 %v668_v45, %v667_v44  ;;  %v656_v1 = vld [vmem:[#allocation2 + $0x30] sm:$0xff]  ;;  %v657_v2 = vld [vmem:[#allocation2 + $0x38] sm:$0xff]  ;;  %v675_v4 = vld [vmem:[#allocation2 + $0xc0] sm:$0xff] }
  0x1c   :  { %1046 = vmatmul.mubr.msk.f32.gmra.mrb[2].mxu0 %vm153_vm1, %v103_v9  ;;  %v125_v26 = vsel %vm1545_vm4, 0.0, %v112_v25  ;;  %vm1566_vm6 = vcmp.eq.s32.totalorder %v57_v32, 15  ;;  %v1276_v49 = vpack.c.bf16 %v651_v48, %v650_v47  ;;  %v1248_v52 = vpack.c.bf16 %v670_v51, %v669_v50  ;;  %v676_v5 = vld [vmem:[#allocation2 + $0xc8] sm:$0xff]  ;;  %v658_v7 = vld [vmem:[#allocation2 + $0x40] sm:$0xff]  ;;  %v660_v14 = vld [vmem:[#allocation2 + $0x50] sm:$0xff] }
  0x1d   :  { %247 = vmatprep.mubr.f32.mxu0 %v1430_v0  ;;  %v145_v38 = vsel %vm1566_vm6, 0.0, %v133_v35  ;;  %v71_v39 = vand.u32 15, %v45_v36  ;;  %v132_v40 = vsel %vm131_vm5, %v129_v31, %v130_v37  ;;  %v135_v42 = vsel %vm131_vm5, %v130_v37, %v127_v28  ;;  %v659_v8 = vld [vmem:[#allocation2 + $0x48] sm:$0xff]  ;;  %v661_v15 = vld [vmem:[#allocation2 + $0x58] sm:$0xff]  ;;  %v679_v18 = vld [vmem:[#allocation2 + $0xe0] sm:$0xff] }
  0x1e   :  { %1277 = vmatprep.subr.bf16.mxu1 %v1276_v49  ;;  %v1280_v55 = vpack.c.bf16 %v653_v54, %v652_v53  ;;  %v1252_v58 = vpack.c.bf16 %v672_v57, %v671_v56  ;;  %v1284_v61 = vpack.c.bf16 %v655_v60, %v654_v59  ;;  %v1288_v3 = vpack.c.bf16 %v657_v2, %v656_v1  ;;  %v680_v19 = vld [vmem:[#allocation2 + $0xe8] sm:$0xff]  ;;  %v662_v21 = vld [vmem:[#allocation2 + $0x60] sm:$0xff]  ;;  %v681_v25 = vld [vmem:[#allocation2 + $0xf0] sm:$0xff] }
  0x1f   :  { %vm1581_vm7 = vcmp.eq.s32.totalorder %v71_v39, 15  ;;  %1279 = vmatpush3.bf16.msra.mxu1 %v1276_v49  ;;  %v1292_v9 = vpack.c.bf16 %v659_v8, %v658_v7  ;;  %v1296_v17 = vpack.c.bf16 %v661_v15, %v660_v14  ;;  %v663_v22 = vld [vmem:[#allocation2 + $0x68] sm:$0xff]  ;;  %v664_v28 = vld [vmem:[#allocation2 + $0x70] sm:$0xff]  ;;  %v665_v29 = vld [vmem:[#allocation2 + $0x78] sm:$0xff] }
  0x20   :  { %1047 = vmatmul.mubr.msk.f32.gmra.mrb[4].mxu0 %vm153_vm1, %v104_v12  ;;  %v147_v43 = vsel %vm1581_vm7, 0.0, %v135_v42  ;;  %1281 = vmatprep.subr.bf16.mxu1 %v1280_v55  ;;  %v678_v12 = vld [vmem:[#allocation2 + $0xd8] sm:$0xff]  ;;  %v854_v31 = vld [vmem:[#allocation2 + $0x100] sm:$0xff]  ;;  %v855_v32 = vld [vmem:[#allocation2 + $0x108] sm:$0xff] }
  0x21   :  { %253 = vmatprep.mubr.f32.mxu0 %v1430_v0  ;;  %vm1062_vm8 = vmneg %vm1529_vm3 }
  0x22   :  { %vm1064_vm9 = vmneg %vm1545_vm4 }
  0x23   :  { %1283 = vmatpush3.bf16.msra.mxu1 %v1280_v55  ;;  %vm1066_vm10 = vmneg %vm1566_vm6 }
  0x24   :  { %1048 = vmatmul.mubr.msk.f32.gmra.mrb[6].mxu0 %vm153_vm1, %v105_v11  ;;  %1285 = vmatprep.subr.bf16.mxu1 %v1284_v61  ;;  %v677_v11 = vld [vmem:[#allocation2 + $0xd0] sm:$0xff]  ;;  %vm1068_vm11 = vmneg %vm1581_vm7 }
  0x25   :  { %342 = vmatprep.mubr.f32.mxu0 %v1430_v0  ;;  %v1264_v13 = vpack.c.bf16 %v678_v12, %v677_v11 }
  0x27   :  { %1287 = vmatpush3.bf16.msra.mxu1 %v1284_v61 }
  0x28   :  { %1051 = vmatmul.mubr.msk.f32.vlgmr.msra.gmra.mrb[0].mxu0 %vm153_vm1, %v123_v20  ;;  %1289 = vmatprep.subr.bf16.mxu1 %v1288_v3  ;;  %v1268_v20 = vpack.c.bf16 %v680_v19, %v679_v18 }
  0x29   :  { %1057 = vmatpush1.msk.msra.mxu0 %vm166_vm0, %v1055_v6  ;;  %348 = vmatprep.mubr.f32.mxu0 %v1430_v0  ;;  %v1260_v6 = vpack.c.bf16 %v676_v5, %v675_v4 }
  0x2a   :  { %1245 = vmatprep.subr.bf16.mxu0 %v1244_v46 }
  0x2b   :  { %1291 = vmatpush3.bf16.msra.mxu1 %v1288_v3 }
  0x2c   :  { %1052 = vmatmul.mubr.msk.f32.gmra.mrb[2].mxu0 %vm153_vm1, %v113_v23  ;;  %1293 = vmatprep.subr.bf16.mxu1 %v1292_v9  ;;  %v1300_v23 = vpack.c.bf16 %v663_v22, %v662_v21 }
  0x2d   :  { %354 = vmatprep.mubr.f32.mxu0 %v1430_v0 }
  0x2f   :  { %1295 = vmatpush3.bf16.msra.mxu1 %v1292_v9 }
  0x30   :  { %1053 = vmatmul.mubr.msk.f32.gmra.mrb[4].mxu0 %vm153_vm1, %v125_v26  ;;  %1297 = vmatprep.subr.bf16.mxu1 %v1296_v17  ;;  %v682_v26 = vld [vmem:[#allocation2 + $0xf8] sm:$0xff] }
  0x31   :  { %360 = vmatprep.mubr.f32.mxu0 %v1430_v0  ;;  %v1272_v27 = vpack.c.bf16 %v682_v26, %v681_v25 }
  0x33   :  { %1299 = vmatpush3.bf16.msra.mxu1 %v1296_v17 }
  0x34   :  { %1054 = vmatmul.mubr.msk.f32.gmra.mrb[6].mxu0 %vm153_vm1, %v111_v30  ;;  %1301 = vmatprep.subr.bf16.mxu1 %v1300_v23  ;;  %v1304_v30 = vpack.c.bf16 %v665_v29, %v664_v28 }
  0x35   :  { %451 = vmatprep.mubr.f32.mxu0 %v1430_v0 }
  0x37   :  { %1303 = vmatpush3.bf16.msra.mxu1 %v1300_v23 }
  0x38   :  { %1058 = vmatmul.mubr.msk.f32.vlgmr.msra.gmra.mrb[0].mxu0 %vm153_vm1, %v134_v33  ;;  %1305 = vmatprep.subr.bf16.mxu1 %v1304_v30  ;;  %v1592_v33 = vpack.c.bf16 %v855_v32, %v854_v31 }
  0x39   :  { %457 = vmatprep.mubr.f32.mxu0 %v1430_v0  ;;  %1247 = vmatpush3.bf16.msra.mxu0 %v1244_v46 }
  0x3a   :  { %1249 = vmatprep.subr.bf16.mxu0 %v1248_v52 }
  0x3b   :  { %1307 = vmatpush3.bf16.msra.mxu1 %v1304_v30 }
  0x3c   :  { %1059 = vmatmul.mubr.msk.f32.gmra.mrb[2].mxu0 %vm153_vm1, %v145_v38  ;;  %1309 = vmatprep.subr.bf16.mxu1 %v1592_v33 }
  0x3d   :  { %463 = vmatprep.mubr.f32.mxu0 %v1430_v0  ;;  %1251 = vmatpush3.bf16.msra.mxu0 %v1248_v52 }
  0x3e   :  { %1253 = vmatprep.subr.bf16.mxu0 %v1252_v58 }
  0x40   :  { %1060 = vmatmul.mubr.msk.f32.gmra.mrb[4].mxu0 %vm153_vm1, %v132_v40 }
  0x41   :  { %469 = vmatprep.mubr.f32.mxu0 %v1430_v0  ;;  %1255 = vmatpush3.bf16.msra.mxu0 %v1252_v58  ;;  %v1256_v0 = vpack.c.bf16 %v674_v63, %v673_v62 }
  0x43   :  { %1257 = vmatprep.subr.bf16.mxu0 %v1256_v0 }
  0x44   :  { %1061 = vmatmul.mubr.msk.f32.gmra.mrb[6].mxu0 %vm153_vm1, %v147_v43 }
  0x45   :  { %1259 = vmatpush3.bf16.msra.mxu0 %v1256_v0 }
  0x46   :  { %1261 = vmatprep.subr.bf16.mxu0 %v1260_v6 }
  0x49   :  { %1263 = vmatpush3.bf16.msra.mxu0 %v1260_v6 }
  0x4a   :  { %1265 = vmatprep.subr.bf16.mxu0 %v1264_v13 }
  0x4d   :  { %1267 = vmatpush3.bf16.msra.mxu0 %v1264_v13 }
  0x4e   :  { %1269 = vmatprep.subr.bf16.mxu0 %v1268_v20 }
  0x51   :  { %1271 = vmatpush3.bf16.msra.mxu0 %v1268_v20 }
  0x52   :  { %1273 = vmatprep.subr.bf16.mxu0 %v1272_v27 }
  0x55   :  { %1275 = vmatpush3.bf16.msra.mxu0 %v1272_v27 }
 0x10b   :  { %v1595_v35 = vpop.f32.mrb[0].mxu0 }
 0x10c   :  { %v1597_v36 = vpop.f32.mrb[1].mxu0  ;;  %v502_v38 = vmul.f32 %v1595_v35, %v1595_v35 }
 0x10d   :  { %v503_v43 = vmul.f32 %v1597_v36, %v1597_v36 }
 0x10f   :  { %v1599_v37 = vpop.f32.mrb[2].mxu0 }
 0x110   :  { %v484_v39 = vadd.f32 %v1599_v37, %v1595_v35  ;;  %v504_v40 = vmul.f32 %v1599_v37, %v1599_v37  ;;  %v1607_v42 = vpop.f32.mrb[3].mxu0 }
 0x111   :  { %v493_v44 = vadd.f32 %v1607_v42, %v1597_v36  ;;  %v505_v45 = vmul.f32 %v1607_v42, %v1607_v42 }
 0x112   :  { %v510_v46 = vadd.f32 %v504_v40, %v502_v38 }
 0x113   :  { %v519_v47 = vadd.f32 %v505_v45, %v503_v43  ;;  %v1615_v48 = vpop.f32.mrb[4].mxu0 }
 0x114   :  { %v485_v49 = vadd.f32 %v484_v39, %v1615_v48  ;;  %v506_v50 = vmul.f32 %v1615_v48, %v1615_v48  ;;  %v1620_v51 = vpop.f32.mrb[5].mxu0 }
 0x115   :  { %v494_v52 = vadd.f32 %v493_v44, %v1620_v51  ;;  %v507_v53 = vmul.f32 %v1620_v51, %v1620_v51 }
 0x116   :  { %v511_v54 = vadd.f32 %v510_v46, %v506_v50  ;;  %v1431_v46 = vmov 1966171168  }
 0x117   :  { %v520_v55 = vadd.f32 %v519_v47, %v507_v53  ;;  %v1625_v56 = vpop.f32.mrb[6].mxu0  ;;  %v547_v47 = vunpack.c.l.s4 %v1431_v46 }
 0x118   :  { %v486_v57 = vadd.f32 %v485_v49, %v1625_v56  ;;  %v508_v58 = vmul.f32 %v1625_v56, %v1625_v56  ;;  %v473_v59 = vpop.f32.mrb[7].mxu0 }
 0x119   :  { %v495_v60 = vadd.f32 %v494_v52, %v473_v59  ;;  %v509_v61 = vmul.f32 %v473_v59, %v473_v59  ;;  %v548_v49 = vunpack.c.0.s8 %v547_v47 }
 0x11a   :  { %v487_v62 = vrot.slane %v486_v57, 4  ;;  %v512_v63 = vadd.f32 %v511_v54, %v508_v58 }
 0x11b   :  { %v496_v0 = vrot.slane %v495_v60, 4  ;;  %v521_v1 = vadd.f32 %v520_v55, %v509_v61  ;;  %v551_v52 = vsub.s32 %v548_v49, %v1513_v10  ;;  %v570_v61 = vsub.s32 1, %v1513_v10  ;;  %v858_v49 = vld [vmem:[#allocation2 + $0x120] sm:$0xff] }
 0x11c   :  { %v488_v2 = vadd.f32 %v487_v62, %v486_v57  ;;  %v513_v3 = vrot.slane %v512_v63, 4  ;;  %v538_v57 = vld [vmem:[%s1712_s2] sm:$0x3] }
 0x11d   :  { %v497_v4 = vadd.f32 %v496_v0, %v495_v60  ;;  %v522_v5 = vrot.slane %v521_v1, 4  ;;  %v1635_v60 = vsub.s32 0, %v1513_v10 }
 0x11e   :  { %v489_v6 = vrot.slane %v488_v2, 2  ;;  %v514_v7 = vadd.f32 %v513_v3, %v512_v63 }
 0x11f   :  { %v498_v8 = vrot.slane %v497_v4, 2  ;;  %v523_v9 = vadd.f32 %v522_v5, %v521_v1 }
 0x120   :  { %v490_v11 = vadd.f32 %v489_v6, %v488_v2  ;;  %v515_v12 = vrot.slane %v514_v7, 2 }
 0x121   :  { %v499_v13 = vadd.f32 %v498_v8, %v497_v4  ;;  %v524_v14 = vrot.slane %v523_v9, 2 }
 0x122   :  { %v491_v15 = vrot.slane %v490_v11, 1  ;;  %v516_v17 = vadd.f32 %v515_v12, %v514_v7 }
 0x123   :  { %v500_v18 = vrot.slane %v499_v13, 1  ;;  %v525_v19 = vadd.f32 %v524_v14, %v523_v9 }
 0x124   :  { %v492_v20 = vadd.f32 %v491_v15, %v490_v11  ;;  %v517_v21 = vrot.slane %v516_v17, 1 }
 0x125   :  { %v501_v22 = vadd.f32 %v500_v18, %v499_v13  ;;  %v526_v23 = vrot.slane %v525_v19, 1 }
 0x126   :  { %v518_v25 = vadd.f32 %v517_v21, %v516_v17  ;;  %v528_v26 = vmul.f32 0.03125, %v492_v20 }
 0x127   :  { %v527_v27 = vadd.f32 %v526_v23, %v525_v19  ;;  %v529_v28 = vmul.f32 0.03125, %v501_v22 }
 0x128   :  { %v530_v29 = vmul.f32 0.03125, %v518_v25  ;;  %v532_v30 = vmul.f32 %v528_v26, %v528_v26  ;;  %v856_v25 = vld [vmem:[#allocation2 + $0x110] sm:$0xff] }
 0x129   :  { %v531_v31 = vmul.f32 0.03125, %v527_v27  ;;  %v533_v32 = vmul.f32 %v529_v28, %v529_v28 }
 0x12a   :  { %v534_v38 = vsub.f32 %v530_v29, %v532_v30 }
 0x12b   :  { %v535_v39 = vsub.f32 %v531_v31, %v533_v32 }
 0x12c   :  { %v536_v40 = vmax.f32 %v534_v38, 0.0 }
 0x12d   :  { %v537_v43 = vmax.f32 %v535_v39, 0.0 }
 0x12e   :  { %v539_v44 = vadd.f32 1e-05, %v536_v40 }
 0x12f   :  { %v540_v45 = vadd.f32 1e-05, %v537_v43 }
 0x130   :  { %1373 = vrsqrt.f32 %v539_v44 }
 0x131   :  { %1375 = vrsqrt.f32 %v540_v45 }
 0x13a   :  { %v1374_v50 = vpop.eup %1373 }
 0x13b   :  { %v1376_v53 = vpop.eup %1375 }
 0x13c   :  { %v545_v54 = vcombine.low %v1374_v50, %v1376_v53  ;;  %v859_v50 = vld [vmem:[#allocation2 + $0x128] sm:$0xff] }
 0x13d   :  { %v1316_v24 = vpack.c.bf16 %v859_v50, %v858_v49  ;;  %v986_v50 = vld [vmem:[%s1715_s5] sm:$0x1]  ;;  %s1432_s5 = smov [#allocation5]  }
 0x13e   :  { %v552_v55 = vrot.slane %v545_v54, %v551_v52  ;;  %v860_v54 = vld [vmem:[#allocation2 + $0x130] sm:$0xff]  ;;  %s1030_s9 = sshll.u32 %s1432_s5, 4  ;;  %s1031_s9 = int_to_ptr.vmem [resolvable:$true] %s1030_s9 }
 0x13f   :  { %p1406_p9 = scmp.lt.s32.totalorder %s1031_s9, %s1031_s9 }
 0x140   :  { %v559_v58 = vrot.slane %v552_v55, %v551_v52  ;;  %v861_v55 = vld [vmem:[#allocation2 + $0x138] sm:$0xff] }
 0x142   :  { %v561_v62 = vmul.f32 %v559_v58, %v538_v57  ;;  %v1320_v57 = vpack.c.bf16 %v861_v55, %v860_v54  ;;  %v862_v58 = vld [vmem:[#allocation2 + $0x140] sm:$0xff] }
 0x144   :  { %v567_v63 = vrot.slane %v561_v62, %v1635_v60  ;;  %v571_v0 = vrot.slane %v561_v62, %v570_v61  ;;  %v864_v62 = vld [vmem:[#allocation2 + $0x150] sm:$0xff] }
 0x146   :  { %v574_v1 = vmul.f32 %v567_v63, %v528_v26  ;;  %v575_v2 = vmul.f32 %v571_v0, %v529_v28  ;;  %v602_v3 = vmul.f32 %v571_v0, %v473_v59  ;;  %v595_v4 = vmul.f32 %v567_v63, %v1595_v35  ;;  %v562_v59 = vld [vmem:[%s1713_s3] sm:$0x3]  ;;  %v857_v26 = vld [vmem:[#allocation2 + $0x118] sm:$0xff] }
 0x147   :  { %v597_v5 = vmul.f32 %v567_v63, %v1599_v37  ;;  %v599_v6 = vmul.f32 %v567_v63, %v1615_v48  ;;  %v601_v7 = vmul.f32 %v567_v63, %v1625_v56  ;;  %v600_v8 = vmul.f32 %v571_v0, %v1620_v51  ;;  %v865_v63 = vld [vmem:[#allocation2 + $0x158] sm:$0xff] }
 0x148   :  { %v578_v9 = vcombine.low %v574_v1, %v575_v2  ;;  %v596_v11 = vmul.f32 %v571_v0, %v1597_v36  ;;  %v598_v12 = vmul.f32 %v571_v0, %v1607_v42  ;;  %v1312_v44 = vpack.c.bf16 %v857_v26, %v856_v25  ;;  %v866_v0 = vld [vmem:[#allocation2 + $0x160] sm:$0xff]  ;;  %v867_v1 = vld [vmem:[#allocation2 + $0x168] sm:$0xff] }
 0x149   :  { %v1332_v2 = vpack.c.bf16 %v867_v1, %v866_v0 }
 0x14a   :  { %v585_v13 = vrot.slane %v578_v9, %v551_v52 }
 0x14c   :  { %v592_v14 = vrot.slane %v585_v13, %v551_v52 }
 0x14e   :  { %v594_v35 = vsub.f32 %v562_v59, %v592_v14 }
 0x150   :  { %v611_v15 = vrot.slane %v594_v35, %v570_v61  ;;  %v607_v37 = vrot.slane %v594_v35, %v1635_v60  ;;  %v863_v61 = vld [vmem:[#allocation2 + $0x148] sm:$0xff] }
 0x151   :  { %v1324_v10 = vpack.c.bf16 %v863_v61, %v862_v58 }
 0x152   :  { %v1650_v48 = vadd.f32 %v611_v15, %v602_v3  ;;  %v614_v56 = vadd.f32 %v607_v37, %v595_v4  ;;  %v616_v17 = vadd.f32 %v607_v37, %v597_v5  ;;  %v618_v51 = vadd.f32 %v607_v37, %v599_v6  ;;  %v868_v3 = vld [vmem:[#allocation2 + $0x170] sm:$0xff]  ;;  %v869_v4 = vld [vmem:[#allocation2 + $0x178] sm:$0xff] }
 0x153   :  { %v620_v18 = vadd.f32 %v607_v37, %v601_v7  ;;  %v1652_v19 = vadd.f32 %v611_v15, %v600_v8  ;;  %v1654_v36 = vadd.f32 %v611_v15, %v596_v11  ;;  %v1656_v42 = vadd.f32 %v611_v15, %v598_v12 }
 0x154   :  { %v622_v20 = vmax.f32 %v614_v56, 0.0  ;;  %v623_v21 = vmax.f32 %v616_v17, 0.0  ;;  %v624_v22 = vmax.f32 %v618_v51, 0.0  ;;  %v1336_v5 = vpack.c.bf16 %v869_v4, %v868_v3 }
 0x155   :  { %v625_v23 = vmax.f32 %v620_v18, 0.0 }
 0x156   :  { %1162 = vmatprep.mubr.f32.mxu0 %v622_v20  ;;  %v640_v27 = vrot.slane %v624_v22, 1  ;;  %v626_v28 = vrot.slane %v622_v20, 7  ;;  %v627_v29 = vrot.slane %v623_v21, 7  ;;  %v628_v30 = vrot.slane %v624_v22, 7 }
 0x157   :  { %1163 = vmatmul.mubr.f32.vlgmr.msra.gmra.mrb[8].mxu0 %v623_v21  ;;  %v629_v31 = vrot.slane %v625_v23, 7  ;;  %v638_v32 = vrot.slane %v622_v20, 1  ;;  %v639_v38 = vrot.slane %v623_v21, 1  ;;  %v641_v39 = vrot.slane %v625_v23, 1 }
 0x158   :  { %1165 = vmatprep.mubr.f32.mxu0 %v624_v22  ;;  %v632_v40 = vsel %vm110_vm2, %v626_v28, %v627_v29  ;;  %v631_v43 = vsel %vm110_vm2, %v627_v29, %v628_v30 }
 0x159   :  { %v633_v45 = vsel %vm110_vm2, %v629_v31, %v626_v28  ;;  %v630_v16 = vsel %vm110_vm2, %v628_v30, %v629_v31  ;;  %v644_v46 = vsel %vm131_vm5, %v638_v32, %v639_v38  ;;  %v643_v47 = vsel %vm131_vm5, %v639_v38, %v640_v27 }
 0x15a   :  { %1200 = vmatprep.mubr.msk.f32.mxu1 %vm1062_vm8, %v633_v45  ;;  %v642_v52 = vsel %vm131_vm5, %v640_v27, %v641_v39  ;;  %v645_v53 = vsel %vm131_vm5, %v641_v39, %v638_v32 }
 0x15b   :  { %1201 = vmatmul.mubr.f32.vlgmr.msra.gmra.mrb[0].mxu1 %v632_v40  ;;  %1166 = vmatmul.mubr.f32.gmra.mrb[10].mxu0 %v625_v23 }
 0x15c   :  { %1311 = vmatpush3.bf16.msra.mxu1 %v1592_v33  ;;  %1203 = vmatprep.mubr.msk.f32.mxu1 %vm1064_vm9, %v631_v43  ;;  %v1328_v33 = vpack.c.bf16 %v865_v63, %v864_v62 }
 0x15d   :  { %1313 = vmatprep.subr.bf16.mxu1 %v1312_v44 }
 0x15f   :  { %1204 = vmatmul.mubr.f32.gmra.mrb[2].mxu1 %v630_v16 }
 0x160   :  { %1315 = vmatpush3.bf16.msra.mxu1 %v1312_v44  ;;  %1238 = vmatprep.mubr.f32.mxu1 %v644_v46 }
 0x161   :  { %1317 = vmatprep.subr.bf16.mxu1 %v1316_v24 }
 0x164   :  { %1319 = vmatpush3.bf16.msra.mxu1 %v1316_v24  ;;  %v990_v24 = vld [vmem:[%s1716_s6] sm:$0x1]  ;;  %s1401_s6 = scalar_lea.vmem %s1031_s9, 512 }
 0x165   :  { %1321 = vmatprep.subr.bf16.mxu1 %v1320_v57  ;;  %p1402_p8 = scmp.ne.s32.totalorder %s1031_s9, %s1401_s6  ;;  %p1407_p10 = scmp.lt.s32.totalorder %s1401_s6, %s1401_s6 }
 0x167   :  { %p1408_p11 = por %p1407_p10, %p1406_p9 }
 0x168   :  { %1323 = vmatpush3.bf16.msra.mxu1 %v1320_v57 }
 0x169   :  { %1325 = vmatprep.subr.bf16.mxu1 %v1324_v10  ;;  %p1409_p12 = pnand %p1408_p11, %p1402_p8 }
 0x16c   :  { %1327 = vmatpush3.bf16.msra.mxu1 %v1324_v10 }
 0x16d   :  { %1329 = vmatprep.subr.bf16.mxu1 %v1328_v33 }
 0x170   :  { %1331 = vmatpush3.bf16.msra.mxu1 %v1328_v33 }
 0x171   :  { %1333 = vmatprep.subr.bf16.mxu1 %v1332_v2 }
 0x174   :  { %1335 = vmatpush3.bf16.msra.mxu1 %v1332_v2 }
 0x175   :  { %1337 = vmatprep.subr.bf16.mxu1 %v1336_v5 }
 0x178   :  { %1339 = vmatpush3.bf16.msra.mxu1 %v1336_v5 }
 0x17b   :  { %1239 = vmatmul.mubr.msk.f32.vlgmr.msra.gmra.mrb[0].mxu1 %vm1066_vm10, %v643_v47 }
 0x17c   :  { %1241 = vmatprep.mubr.f32.mxu1 %v642_v52 }
 0x17f   :  { %1242 = vmatmul.mubr.msk.f32.gmra.mrb[2].mxu1 %vm1068_vm11, %v645_v53 }
 0x22a   :  { %v1164_v6 = vpop.f32.mrb[8].mxu0 }
 0x22b   :  { %v749_v7 = vpop.f32.mrb[9].mxu0 }
 0x22e   :  { %v1167_v8 = vpop.f32.mrb[10].mxu0 }
 0x22f   :  { %v759_v9 = vpop.f32.mrb[11].mxu0 }
 0x24e   :  { %v1240_v11 = vpop.f32.mrb[0].mxu1 }
 0x24f   :  { %v1340_v12 = vadd.f32 %v1240_v11, %v1164_v6  ;;  %v936_v13 = vpop.f32.mrb[1].mxu1 }
 0x250   :  { %v1341_v59 = vadd.f32 %v936_v13, %v749_v7 }
 0x251   :  { %v969_v14 = vmul.f32 %v1340_v12, %v1340_v12 }
 0x252   :  { %v959_v35 = vadd.f32 %v1341_v59, %v1340_v12  ;;  %v968_v15 = vmul.f32 %v1341_v59, %v1341_v59  ;;  %v1243_v34 = vpop.f32.mrb[2].mxu1 }
 0x253   :  { %v1342_v37 = vadd.f32 %v1243_v34, %v1167_v8  ;;  %v946_v56 = vpop.f32.mrb[3].mxu1 }
 0x254   :  { %v972_v17 = vadd.f32 %v969_v14, %v968_v15  ;;  %v1343_v51 = vadd.f32 %v946_v56, %v759_v9 }
 0x255   :  { %v971_v20 = vmul.f32 %v1342_v37, %v1342_v37 }
 0x256   :  { %v960_v18 = vadd.f32 %v1343_v51, %v959_v35  ;;  %v970_v41 = vmul.f32 %v1343_v51, %v1343_v51 }
 0x258   :  { %v961_v21 = vadd.f32 %v1342_v37, %v960_v18  ;;  %v973_v22 = vadd.f32 %v972_v17, %v970_v41 }
 0x25a   :  { %v962_v23 = vrot.slane %v961_v21, 4  ;;  %v974_v25 = vadd.f32 %v973_v22, %v971_v20 }
 0x25c   :  { %v963_v26 = vadd.f32 %v962_v23, %v961_v21  ;;  %v975_v27 = vrot.slane %v974_v25, 4 }
 0x25e   :  { %v964_v28 = vrot.slane %v963_v26, 2  ;;  %v976_v29 = vadd.f32 %v975_v27, %v974_v25 }
 0x260   :  { %v965_v30 = vadd.f32 %v964_v28, %v963_v26  ;;  %v977_v31 = vrot.slane %v976_v29, 2 }
 0x262   :  { %v966_v32 = vrot.slane %v965_v30, 1  ;;  %v978_v38 = vadd.f32 %v977_v31, %v976_v29 }
 0x264   :  { %v967_v39 = vadd.f32 %v966_v32, %v965_v30  ;;  %v979_v40 = vrot.slane %v978_v38, 1 }
 0x266   :  { %v980_v43 = vadd.f32 %v979_v40, %v978_v38  ;;  %v981_v44 = vmul.f32 0.03125, %v967_v39 }
 0x268   :  { %v982_v45 = vmul.f32 0.03125, %v980_v43  ;;  %v983_v16 = vmul.f32 %v981_v44, %v981_v44 }
 0x26a   :  { %v984_v46 = vsub.f32 %v982_v45, %v983_v16 }
 0x26c   :  { %v985_v47 = vmax.f32 %v984_v46, 0.0 }
 0x26e   :  { %v987_v49 = vadd.f32 1e-05, %v985_v47 }
 0x270   :  { %1377 = vrsqrt.f32 %v987_v49 }
 0x27a   :  { %v1378_v52 = vpop.eup %1377 }
 0x27b   :  { %v989_v53 = vmul.f32 %v1378_v52, %v986_v50 }
 0x27d   :  { %v991_v54 = vmul.f32 %v989_v53, %v981_v44  ;;  %v997_v55 = vrot.slane %v989_v53, %v1635_v60 }
 0x27f   :  { %v992_v57 = vsub.f32 %v990_v24, %v991_v54  ;;  %v1001_v58 = vmul.f32 %v1343_v51, %v997_v55  ;;  %v999_v61 = vmul.f32 %v1341_v59, %v997_v55  ;;  %v1000_v10 = vmul.f32 %v1340_v12, %v997_v55 }
 0x280   :  { %v1002_v62 = vmul.f32 %v1342_v37, %v997_v55 }
 0x281   :  { %v1007_v63 = vrot.slane %v992_v57, %v1635_v60 }
 0x283   :  { %v1011_v33 = vadd.f32 %v1007_v63, %v1001_v58  ;;  %v1009_v0 = vadd.f32 %v1007_v63, %v999_v61  ;;  %v1010_v1 = vadd.f32 %v1007_v63, %v1000_v10  ;;  %v1012_v2 = vadd.f32 %v1007_v63, %v1002_v62 }
 0x285   :  { %v1015_v3 = vadd.f32 %v1011_v33, %v1652_v19  ;;  %v1013_v4 = vadd.f32 %v1009_v0, %v1654_v36  ;;  %v1014_v5 = vadd.f32 %v1010_v1, %v1656_v42  ;;  %v1016_v6 = vadd.f32 %v1012_v2, %v1650_v48 }
 0x287   :  { %v1019_v7 = vmax.f32 %v1015_v3, 0.0  ;;  %v1017_v8 = vmax.f32 %v1013_v4, 0.0  ;;  %v1018_v9 = vmax.f32 %v1014_v5, 0.0  ;;  %v1020_v11 = vmax.f32 %v1016_v6, 0.0 }
 0x289   :  { %1023 = vst [vmem:[#allocation5 + $0x10] sm:$0xff] %v1019_v7  ;;  %1021 = vst [vmem:[#allocation5] sm:$0xff] %v1017_v8 }
 0x28a   :  { %1022 = vst [vmem:[#allocation5 + $0x8] sm:$0xff] %v1018_v9  ;;  %1024 = vst [vmem:[#allocation5 + $0x18] sm:$0xff] %v1020_v11 }
 0x28b   :  { %1412 = shalt.err (!%p1409_p12)
}
 0x28c   :  { %s1413_s14 = scalar_lea.hbm %s1717_s7, 512 }
 0x28d   :  { %p1414_p13 = scmp.ne.s32.totalorder %s1717_s7, %s1413_s14  ;;  %p1417_p0 = scmp.lt.u32.totalorder %s1413_s14, %s1717_s7 }
 0x28f   :  { %p1419_p1 = pnand %p1417_p0, %p1414_p13 }
 0x291   :  { %1422 = shalt.err (!%p1419_p1)
}
 0x292   :  { %1036 = dma.vmem_to_hbm [thread:$0]  %s1031_s9, 512, %s1717_s7, [#allocation4], %s1428_s11, %s1428_s11, %s1429_s12  }
 0x293   :  { %1425 = dma.done.wait [#allocation4], 512  }
 0x294   :  { %1426 = vsyncadd [#allocation4], 4294966784 }
 0x295   :  { %1040 = vsyncpa [#allocation3], 1 }
 0x296   :  { %1041 = vsyncpa [#allocation4], 1 }

</bundles_post_ra>
